<compile_context>
chip_gen: v7x
topology: tpu7x:2x2x1
jax: 0.10.0
libtpu: 0.0.40
codegen_flags: <defaults>
</compile_context>

<pallas_src>
import numpy as np
import jax
import jax.numpy as jnp
from jax.experimental import pallas as pl
from jax.experimental.pallas import tpu as pltpu


# ---------------------------------------------------------------------------
# Host-side helpers (static shapes -> static matrices / folded weights)
# ---------------------------------------------------------------------------
def adaptive_pool_matrix(H, W, P):
    """(H*W, P*P) matrix whose column (ph*P+pw) averages PyTorch's adaptive bin."""
    m = np.zeros((H * W, P * P), dtype=np.float32)
    for ph in range(P):
        h0 = (ph * H) // P
        h1 = -(-((ph + 1) * H) // P)
        for pw in range(P):
            w0 = (pw * W) // P
            w1 = -(-((pw + 1) * W) // P)
            inv = 1.0 / float((h1 - h0) * (w1 - w0))
            for h in range(h0, h1):
                for w in range(w0, w1):
                    m[h * W + w, ph * P + pw] = inv
    return jnp.asarray(m)


def build_params(w_last, gamma, beta, run_mean, run_var, eps,
                 wc, wl, bl, hw_list, pool_out, num_samples):
    Cmb = w_last.shape[0]
    scale = gamma / jnp.sqrt(run_var + eps)
    shift = beta - run_mean * scale
    w_fold = w_last * scale[:, None]                     # BN scale folded into conv
    wh_full = wl @ wc                                    # (K, Cmb*num_samples)
    wh_parts = [wh_full[:, i * Cmb:(i + 1) * Cmb] for i in range(num_samples)]
    pool_mats = [adaptive_pool_matrix(h, w, pool_out) for (h, w) in hw_list]
    return {
        "w_fold": w_fold,                                # (Cmb, Cin)
        "shift": shift.reshape(Cmb, 1),                  # (Cmb, 1)
        "wh_parts": wh_parts,                            # num_samples x (K, Cmb)
        "bh": bl.reshape(-1, 1),                         # (K, 1)
        "pool_mats": pool_mats,                          # num_samples x (H*W, P*P)
    }


# ---------------------------------------------------------------------------
# Fused kernel: ConvBNReLU6 + AdaptiveAvgPool(P) + concat + Conv1x1 +
#               AdaptiveAvgPool(1) + Linear, for one batch element per step.
# ---------------------------------------------------------------------------
def _make_fused_kernel(num_samples):
    S = num_samples

    def kernel(*refs):
        # refs layout:
        #   x_refs[i]:  (1, Cin, H_i*W_i)   one batch element, NCHW flattened
        #   p_refs[i]:  (H_i*W_i, P*P)      adaptive-pool averaging matrix
        #   w_ref:      (Cmb, Cin)          BN-folded 1x1 conv weight
        #   shift_ref:  (Cmb, 1)            BN shift
        #   wh_refs[i]: (K, Cmb)            per-sample slice of folded Wl @ Wc
        #   bh_ref:     (K, 1)              Linear bias
        #   o_ref:      (1, K, 1)           logits for this batch element
        x_refs = refs[0:S]
        p_refs = refs[S:2 * S]
        w_ref = refs[2 * S]
        shift_ref = refs[2 * S + 1]
        wh_refs = refs[2 * S + 2:3 * S + 2]
        bh_ref = refs[3 * S + 2]
        o_ref = refs[3 * S + 3]

        acc = bh_ref[...]                                               # (K, 1)
        for x_ref, p_ref, wh_ref in zip(x_refs, p_refs, wh_refs):
            # 1x1 conv directly on NCHW (channels = contraction axis) -> MXU
            y = jnp.dot(w_ref[...], x_ref[0],
                        preferred_element_type=jnp.float32)             # (Cmb, HW)
            y = jnp.clip(y + shift_ref[...], 0.0, 6.0)                  # BN + ReLU6
            # AdaptiveAvgPool2d(P) as a matmul -> MXU (rides the idle MXU)
            pooled = jnp.dot(y, p_ref[...],
                             preferred_element_type=jnp.float32)        # (Cmb, P*P)
            # Head: AdaptiveAvgPool(1) then folded (Conv1x1 . Linear) slice
            g = jnp.mean(pooled, axis=1, keepdims=True)                 # (Cmb, 1)
            acc = acc + jnp.dot(wh_ref[...], g,
                                preferred_element_type=jnp.float32)     # (K, 1)
        o_ref[0] = acc

    return kernel


def spoofingnet_forward(x_list_nchw, params):
    S = len(x_list_nchw)
    N, Cin = x_list_nchw[0].shape[:2]
    K = params["bh"].shape[0]

    # Free (bitcast) reshape NCHW -> (N, Cin, H*W): no transpose, no HBM pass.
    x_flat = [x.reshape(N, Cin, x.shape[2] * x.shape[3]) for x in x_list_nchw]
    pool_mats = params["pool_mats"]
    wh_parts = params["wh_parts"]

    in_specs = (
        [pl.BlockSpec((1, Cin, xf.shape[2]), lambda n: (n, 0, 0)) for xf in x_flat]
        + [pl.BlockSpec(pm.shape, lambda n: (0, 0)) for pm in pool_mats]
        + [pl.BlockSpec(params["w_fold"].shape, lambda n: (0, 0)),
           pl.BlockSpec(params["shift"].shape, lambda n: (0, 0))]
        + [pl.BlockSpec(wp.shape, lambda n: (0, 0)) for wp in wh_parts]
        + [pl.BlockSpec(params["bh"].shape, lambda n: (0, 0))]
    )

    out = pl.pallas_call(
        _make_fused_kernel(S),
        out_shape=jax.ShapeDtypeStruct((N, K, 1), jnp.float32),
        grid=(N,),
        in_specs=in_specs,
        out_specs=pl.BlockSpec((1, K, 1), lambda n: (n, 0, 0)),
        compiler_params=pltpu.CompilerParams(dimension_semantics=("parallel",)),
    )(*x_flat, *pool_mats, params["w_fold"], params["shift"], *wh_parts, params["bh"])
    return out.reshape(N, K)


# ---------------------------------------------------------------------------
# Plain-JAX reference (mirrors the PyTorch forward) for a sanity check
# ---------------------------------------------------------------------------
def reference_forward(x_list, w_last, scale, shift, wc, wl, bl, pool_out):
    pooled = []
    for x in x_list:
        _, _, H, W = x.shape
        a = jnp.einsum("oi,nihw->nohw", w_last, x)
        a = jnp.clip(a * scale[None, :, None, None] + shift[None, :, None, None],
                     0.0, 6.0)
        P = pool_out
        rows = []
        for ph in range(P):
            h0, h1 = (ph * H) // P, -(-((ph + 1) * H) // P)
            cols = []
            for pw in range(P):
                w0, w1 = (pw * W) // P, -(-((pw + 1) * W) // P)
                cols.append(jnp.mean(a[:, :, h0:h1, w0:w1], axis=(2, 3)))
            rows.append(jnp.stack(cols, axis=-1))
        pooled.append(jnp.stack(rows, axis=-2))          # (N, Cmb, P, P)
    cat = jnp.concatenate(pooled, axis=1)                # (N, Ctot, P, P)
    c = jnp.einsum("fc,nchw->nfhw", wc, cat)             # Conv1x1 (no bias)
    g = jnp.mean(c, axis=(2, 3))                         # AdaptiveAvgPool(1)+view
    return g @ wl.T + bl[None, :]                        # Linear


if __name__ == "__main__":
    # Small, deterministic configuration
    num_classes = 3
    num_samples = 2
    mb_out_channels = 32
    feat_out_channels = 16
    pool_out = 2
    trunk_channels = 320                                  # MobileNetV2 trunk output
    N = 2

    key = jax.random.PRNGKey(0)
    k_w, k_c, k_l, k_b, k_x0, k_x1 = jax.random.split(key, 6)

    # Replaced last layer: Conv2d(320, Cmb, 1, bias=False) + BatchNorm2d (eval) + ReLU6
    w_last = jax.random.normal(k_w, (mb_out_channels, trunk_channels), jnp.float32) * 0.05
    gamma = jnp.ones((mb_out_channels,), jnp.float32)
    beta = jnp.zeros((mb_out_channels,), jnp.float32)
    run_mean = jnp.zeros((mb_out_channels,), jnp.float32)
    run_var = jnp.ones((mb_out_channels,), jnp.float32)
    eps = 1e-5

    # Conv1x1: Conv2d(Cmb*num_samples, feat_out, 1, bias=False), Linear(feat_out -> K)
    wc = jax.random.normal(
        k_c, (feat_out_channels, mb_out_channels * num_samples), jnp.float32) * 0.05
    wl = jax.random.normal(k_l, (num_classes, feat_out_channels), jnp.float32) * 0.1
    bl = jax.random.normal(k_b, (num_classes,), jnp.float32) * 0.1

    # List of differently-sized 320-channel trunk feature maps (NCHW)
    x_list = [
        jax.random.normal(k_x0, (N, trunk_channels, 8, 8), jnp.float32),
        jax.random.normal(k_x1, (N, trunk_channels, 6, 4), jnp.float32),
    ]

    params = build_params(
        w_last, gamma, beta, run_mean, run_var, eps, wc, wl, bl,
        [(x.shape[2], x.shape[3]) for x in x_list], pool_out, num_samples)

    out = spoofingnet_forward(x_list, params)
    jax.block_until_ready(out)
    assert out.shape == (N, num_classes), out.shape

    # Loose sanity check vs. plain-JAX reference (differences are only fp
    # reassociation from BN/head folding and MXU matmul precision).
    scale = gamma / jnp.sqrt(run_var + eps)
    shift = beta - run_mean * scale
    ref = reference_forward(x_list, w_last, scale, shift, wc, wl, bl, pool_out)
    assert jnp.allclose(out, ref, rtol=5e-2, atol=5e-2), (out, ref)

    print("KERNEL_OK")
</pallas_src>

<mosaic_0001>
module attributes {stable_mosaic.version = 11 : i64} {
  func.func @kernel(%arg0: i32, %arg1: memref<1x320x64xf32, #tpu.memory_space<vmem>>, %arg2: memref<1x320x24xf32, #tpu.memory_space<vmem>>, %arg3: memref<64x4xf32, #tpu.memory_space<vmem>>, %arg4: memref<24x4xf32, #tpu.memory_space<vmem>>, %arg5: memref<32x320xf32, #tpu.memory_space<vmem>>, %arg6: memref<32x1xf32, #tpu.memory_space<vmem>>, %arg7: memref<3x32xf32, #tpu.memory_space<vmem>>, %arg8: memref<3x32xf32, #tpu.memory_space<vmem>>, %arg9: memref<3x1xf32, #tpu.memory_space<vmem>>, %arg10: memref<1x3x1xf32, #tpu.memory_space<vmem>>) attributes {dimension_semantics = [#tpu.dimension_semantics<parallel>], iteration_bounds = array<i64: 2>, scalar_prefetch = 0 : i64, scratch_operands = 0 : i64, tpu.core_type = #tpu.core_type<tc>, window_params = [{transform_indices = @transform_0, window_bounds = array<i64: 1, 320, 64>}, {transform_indices = @transform_1, window_bounds = array<i64: 1, 320, 24>}, {pipeline_mode = #tpu.pipeline_mode<synchronous>, transform_indices = @transform_2, window_bounds = array<i64: 64, 4>}, {pipeline_mode = #tpu.pipeline_mode<synchronous>, transform_indices = @transform_3, window_bounds = array<i64: 24, 4>}, {pipeline_mode = #tpu.pipeline_mode<synchronous>, transform_indices = @transform_4, window_bounds = array<i64: 32, 320>}, {pipeline_mode = #tpu.pipeline_mode<synchronous>, transform_indices = @transform_5, window_bounds = array<i64: 32, 1>}, {pipeline_mode = #tpu.pipeline_mode<synchronous>, transform_indices = @transform_6, window_bounds = array<i64: 3, 32>}, {pipeline_mode = #tpu.pipeline_mode<synchronous>, transform_indices = @transform_7, window_bounds = array<i64: 3, 32>}, {pipeline_mode = #tpu.pipeline_mode<synchronous>, transform_indices = @transform_8, window_bounds = array<i64: 3, 1>}, {transform_indices = @transform_9, window_bounds = array<i64: 1, 3, 1>}]} {
    %c0 = arith.constant 0 : index
    %c0_0 = arith.constant 0 : index
    %0 = vector.load %arg9[%c0, %c0_0] : memref<3x1xf32, #tpu.memory_space<vmem>>, vector<3x1xf32>
    %c0_1 = arith.constant 0 : index
    %c0_2 = arith.constant 0 : index
    %1 = vector.load %arg5[%c0_1, %c0_2] : memref<32x320xf32, #tpu.memory_space<vmem>>, vector<32x320xf32>
    %c0_3 = arith.constant 0 : index
    %c0_4 = arith.constant 0 : index
    %c0_5 = arith.constant 0 : index
    %2 = vector.load %arg1[%c0_3, %c0_4, %c0_5] : memref<1x320x64xf32, #tpu.memory_space<vmem>>, vector<1x320x64xf32>
    %3 = vector.shape_cast %2 : vector<1x320x64xf32> to vector<320x64xf32>
    %cst = arith.constant dense<0.000000e+00> : vector<32x64xf32>
    %4 = tpu.matmul %1, %3, %cst {dimension_numbers = #tpu.dot_dimension_numbers<[1], [0], [0], [1], [0, 0, 1, 1], [], []>} : vector<32x320xf32>, vector<320x64xf32>, vector<32x64xf32> -> vector<32x64xf32>
    %c0_6 = arith.constant 0 : index
    %c0_7 = arith.constant 0 : index
    %5 = vector.load %arg6[%c0_6, %c0_7] : memref<32x1xf32, #tpu.memory_space<vmem>>, vector<32x1xf32>
    %6 = vector.broadcast %5 : vector<32x1xf32> to vector<32x64xf32>
    %7 = arith.addf %4, %6 : vector<32x64xf32>
    %cst_8 = arith.constant 0.000000e+00 : f32
    %cst_9 = arith.constant 6.000000e+00 : f32
    %8 = vector.broadcast %cst_8 : f32 to vector<32x64xf32>
    %9 = arith.maximumf %8, %7 : vector<32x64xf32>
    %10 = vector.broadcast %cst_9 : f32 to vector<32x64xf32>
    %11 = arith.minimumf %10, %9 : vector<32x64xf32>
    %c0_10 = arith.constant 0 : index
    %c0_11 = arith.constant 0 : index
    %12 = vector.load %arg3[%c0_10, %c0_11] : memref<64x4xf32, #tpu.memory_space<vmem>>, vector<64x4xf32>
    %cst_12 = arith.constant dense<0.000000e+00> : vector<32x4xf32>
    %13 = tpu.matmul %11, %12, %cst_12 {dimension_numbers = #tpu.dot_dimension_numbers<[1], [0], [0], [1], [0, 0, 1, 1], [], []>} : vector<32x64xf32>, vector<64x4xf32>, vector<32x4xf32> -> vector<32x4xf32>
    %cst_13 = arith.constant dense<0.000000e+00> : vector<32xf32>
    %14 = vector.multi_reduction <add>, %13, %cst_13 [1] : vector<32x4xf32> to vector<32xf32>
    %15 = vector.shape_cast %14 : vector<32xf32> to vector<32x1xf32>
    %cst_14 = arith.constant 4.000000e+00 : f32
    %16 = vector.broadcast %cst_14 : f32 to vector<32x1xf32>
    %17 = arith.divf %15, %16 : vector<32x1xf32>
    %c0_15 = arith.constant 0 : index
    %c0_16 = arith.constant 0 : index
    %18 = vector.load %arg7[%c0_15, %c0_16] : memref<3x32xf32, #tpu.memory_space<vmem>>, vector<3x32xf32>
    %cst_17 = arith.constant dense<0.000000e+00> : vector<3x1xf32>
    %19 = tpu.matmul %18, %17, %cst_17 {dimension_numbers = #tpu.dot_dimension_numbers<[1], [0], [0], [1], [0, 0, 1, 1], [], []>} : vector<3x32xf32>, vector<32x1xf32>, vector<3x1xf32> -> vector<3x1xf32>
    %20 = arith.addf %0, %19 : vector<3x1xf32>
    %c0_18 = arith.constant 0 : index
    %c0_19 = arith.constant 0 : index
    %21 = vector.load %arg5[%c0_18, %c0_19] : memref<32x320xf32, #tpu.memory_space<vmem>>, vector<32x320xf32>
    %c0_20 = arith.constant 0 : index
    %c0_21 = arith.constant 0 : index
    %c0_22 = arith.constant 0 : index
    %22 = vector.load %arg2[%c0_20, %c0_21, %c0_22] : memref<1x320x24xf32, #tpu.memory_space<vmem>>, vector<1x320x24xf32>
    %23 = vector.shape_cast %22 : vector<1x320x24xf32> to vector<320x24xf32>
    %cst_23 = arith.constant dense<0.000000e+00> : vector<32x24xf32>
    %24 = tpu.matmul %21, %23, %cst_23 {dimension_numbers = #tpu.dot_dimension_numbers<[1], [0], [0], [1], [0, 0, 1, 1], [], []>} : vector<32x320xf32>, vector<320x24xf32>, vector<32x24xf32> -> vector<32x24xf32>
    %c0_24 = arith.constant 0 : index
    %c0_25 = arith.constant 0 : index
    %25 = vector.load %arg6[%c0_24, %c0_25] : memref<32x1xf32, #tpu.memory_space<vmem>>, vector<32x1xf32>
    %26 = vector.broadcast %25 : vector<32x1xf32> to vector<32x24xf32>
    %27 = arith.addf %24, %26 : vector<32x24xf32>
    %cst_26 = arith.constant 0.000000e+00 : f32
    %cst_27 = arith.constant 6.000000e+00 : f32
    %28 = vector.broadcast %cst_26 : f32 to vector<32x24xf32>
    %29 = arith.maximumf %28, %27 : vector<32x24xf32>
    %30 = vector.broadcast %cst_27 : f32 to vector<32x24xf32>
    %31 = arith.minimumf %30, %29 : vector<32x24xf32>
    %c0_28 = arith.constant 0 : index
    %c0_29 = arith.constant 0 : index
    %32 = vector.load %arg4[%c0_28, %c0_29] : memref<24x4xf32, #tpu.memory_space<vmem>>, vector<24x4xf32>
    %cst_30 = arith.constant dense<0.000000e+00> : vector<32x4xf32>
    %33 = tpu.matmul %31, %32, %cst_30 {dimension_numbers = #tpu.dot_dimension_numbers<[1], [0], [0], [1], [0, 0, 1, 1], [], []>} : vector<32x24xf32>, vector<24x4xf32>, vector<32x4xf32> -> vector<32x4xf32>
    %cst_31 = arith.constant dense<0.000000e+00> : vector<32xf32>
    %34 = vector.multi_reduction <add>, %33, %cst_31 [1] : vector<32x4xf32> to vector<32xf32>
    %35 = vector.shape_cast %34 : vector<32xf32> to vector<32x1xf32>
    %cst_32 = arith.constant 4.000000e+00 : f32
    %36 = vector.broadcast %cst_32 : f32 to vector<32x1xf32>
    %37 = arith.divf %35, %36 : vector<32x1xf32>
    %c0_33 = arith.constant 0 : index
    %c0_34 = arith.constant 0 : index
    %38 = vector.load %arg8[%c0_33, %c0_34] : memref<3x32xf32, #tpu.memory_space<vmem>>, vector<3x32xf32>
    %cst_35 = arith.constant dense<0.000000e+00> : vector<3x1xf32>
    %39 = tpu.matmul %38, %37, %cst_35 {dimension_numbers = #tpu.dot_dimension_numbers<[1], [0], [0], [1], [0, 0, 1, 1], [], []>} : vector<3x32xf32>, vector<32x1xf32>, vector<3x1xf32> -> vector<3x1xf32>
    %40 = arith.addf %20, %39 : vector<3x1xf32>
    %c0_36 = arith.constant 0 : index
    %c0_37 = arith.constant 0 : index
    %c0_38 = arith.constant 0 : index
    %41 = vector.load %arg10[%c0_36, %c0_37, %c0_38] : memref<1x3x1xf32, #tpu.memory_space<vmem>>, vector<1x3x1xf32>
    %42 = vector.shape_cast %41 : vector<1x3x1xf32> to vector<3x1xf32>
    %43 = vector.shape_cast %40 : vector<3x1xf32> to vector<1x3x1xf32>
    tpu.vector_store %arg10[%c0_36, %c0_37, %c0_38], %43 {strides = array<i32>} : memref<1x3x1xf32, #tpu.memory_space<vmem>>, vector<1x3x1xf32>,
    return
  }
  func.func @transform_0(%arg0: i32) -> (i32, i32, i32) {
    %c0_i32 = arith.constant 0 : i32
    %c0_i32_0 = arith.constant 0 : i32
    %c0_i32_1 = arith.constant 0 : i32
    return %arg0, %c0_i32, %c0_i32_0 : i32, i32, i32
  }
  func.func @transform_1(%arg0: i32) -> (i32, i32, i32) {
    %c0_i32 = arith.constant 0 : i32
    %c0_i32_0 = arith.constant 0 : i32
    %c0_i32_1 = arith.constant 0 : i32
    return %arg0, %c0_i32, %c0_i32_0 : i32, i32, i32
  }
  func.func @transform_2(%arg0: i32) -> (i32, i32) {
    %c0_i32 = arith.constant 0 : i32
    %c0_i32_0 = arith.constant 0 : i32
    %c0_i32_1 = arith.constant 0 : i32
    return %c0_i32, %c0_i32_0 : i32, i32
  }
  func.func @transform_3(%arg0: i32) -> (i32, i32) {
    %c0_i32 = arith.constant 0 : i32
    %c0_i32_0 = arith.constant 0 : i32
    %c0_i32_1 = arith.constant 0 : i32
    return %c0_i32, %c0_i32_0 : i32, i32
  }
  func.func @transform_4(%arg0: i32) -> (i32, i32) {
    %c0_i32 = arith.constant 0 : i32
    %c0_i32_0 = arith.constant 0 : i32
    %c0_i32_1 = arith.constant 0 : i32
    return %c0_i32, %c0_i32_0 : i32, i32
  }
  func.func @transform_5(%arg0: i32) -> (i32, i32) {
    %c0_i32 = arith.constant 0 : i32
    %c0_i32_0 = arith.constant 0 : i32
    %c0_i32_1 = arith.constant 0 : i32
    return %c0_i32, %c0_i32_0 : i32, i32
  }
  func.func @transform_6(%arg0: i32) -> (i32, i32) {
    %c0_i32 = arith.constant 0 : i32
    %c0_i32_0 = arith.constant 0 : i32
    %c0_i32_1 = arith.constant 0 : i32
    return %c0_i32, %c0_i32_0 : i32, i32
  }
  func.func @transform_7(%arg0: i32) -> (i32, i32) {
    %c0_i32 = arith.constant 0 : i32
    %c0_i32_0 = arith.constant 0 : i32
    %c0_i32_1 = arith.constant 0 : i32
    return %c0_i32, %c0_i32_0 : i32, i32
  }
  func.func @transform_8(%arg0: i32) -> (i32, i32) {
    %c0_i32 = arith.constant 0 : i32
    %c0_i32_0 = arith.constant 0 : i32
    %c0_i32_1 = arith.constant 0 : i32
    return %c0_i32, %c0_i32_0 : i32, i32
  }
  func.func @transform_9(%arg0: i32) -> (i32, i32, i32) {
    %c0_i32 = arith.constant 0 : i32
    %c0_i32_0 = arith.constant 0 : i32
    %c0_i32_1 = arith.constant 0 : i32
    return %arg0, %c0_i32, %c0_i32_0 : i32, i32, i32
  }
}

</mosaic_0001>

<bundles_post_ra>
// kernel: tpu_custom_call.1
= control target key start
LH: loop header
LB: loop body
LE: loop exit
PB: predicated region body
PF: predicated region fallthrough
CT: control target
= control target key end

     0   :  { %s1772_s30 = smov 0   ;;  %s2060_s0 = inlined_call_operand.vmem [shape: f32[2,320,64], index: 0, kind: input, shape index: {}]   ;;  %s2061_s1 = inlined_call_operand.vmem [shape: f32[2,320,24], index: 1, kind: input, shape index: {}]   ;;  %s2062_s2 = inlined_call_operand.vmem [shape: f32[64,4], index: 2, kind: input, shape index: {}]   ;;  %s2063_s3 = inlined_call_operand.vmem [shape: f32[24,4], index: 3, kind: input, shape index: {}]   ;;  %s2064_s4 = inlined_call_operand.vmem [shape: f32[32,320], index: 4, kind: input, shape index: {}]   ;;  %s2065_s5 = inlined_call_operand.vmem [shape: f32[32,1], index: 5, kind: input, shape index: {}]   ;;  %s2066_s6 = inlined_call_operand.vmem [shape: f32[3,32], index: 6, kind: input, shape index: {}]   ;;  %s2067_s7 = inlined_call_operand.vmem [shape: f32[3,32], index: 7, kind: input, shape index: {}]   ;;  %s2068_s8 = inlined_call_operand.vmem [shape: f32[3,1], index: 8, kind: input, shape index: {}]   ;;  %s2069_s9 = inlined_call_operand.vmem [shape: f32[2,3,1], index: 9, kind: output, shape index: {}]  }
   0x1 LB: > { %s1295_s10 = sadd.s32 4294967295, %s1716_s30   ;;  %p1299_p0 = scmp.ge.s32.totalorder %s1716_s30, 1  ;;  %s1716_s30 = sphi %s1772_s30, %s19_s30  }
   0x2   : > { %p297_p1 = scmp.lt.s32.totalorder %s1716_s30, 3 }
   0x4   : > { %p298_p2 = pnand %p1299_p0, %p297_p1 }
   0x5   : > { %p337_p3 = scmp.lt.s32.totalorder (!%p298_p2), %s1295_s10, 1  ;;  %v1783_v0 = vld [vmem:[%s2064_s4 + $0x8] sm:$0xff] (!%p298_p2)  ;;  %vm428_vm0 = vcmask (!%p298_p2), 523264   ;;  %v1789_v1 = vld [vmem:[%s2064_s4 + $0x10] sm:$0xff] (!%p298_p2)  ;;  %v1718_v2 = vmov (!%p298_p2), 0   ;;  %v404_v3 = vld [vmem:[%s2065_s5] sm:$0xff] (!%p298_p2) }
   0x6   : > { %301 = sbr.rel (%p298_p2) target bundleno = 1472 (0x5c0), region = 56  ;;  %505 = vmatprep.mubr.f32.mxu0 (!%p298_p2), %v1783_v0  ;;  %1708 = vset.pattern.permute.xlu0 (!%p298_p2), %v1718_v2  ;;  %v406_v4 = vld [vmem:[%s2065_s5 + $0x10] sm:$0xff] (!%p298_p2)  ;;  %v405_v5 = vld [vmem:[%s2065_s5 + $0x8] sm:$0xff] (!%p298_p2)  ;;  %v407_v6 = vld [vmem:[%s2065_s5 + $0x18] sm:$0xff] (!%p298_p2)  ;;  %vm724_vm1 = vcmask (!%p298_p2), 31744   ;;  %vm1720_vm2 = vmmov (!%p298_p2), 0  }
   0x7   : > { %1480 = vmatprep.mubr.msk.f32.mxu1 (!%p298_p2), %vm428_vm0, %v1789_v1  ;;  %1709 = vset.pattern.permute.xlu1 (!%p298_p2), %v1718_v2  ;;  %v1863_v62 = vld [vmem:[%s2064_s4 + $0x28] sm:$0xff] (!%p298_p2)  ;;  %v1868_v2 = vld [vmem:[%s2064_s4 + $0x40] sm:$0xff] (!%p298_p2)  ;;  %vm743_vm3 = vcmask (!%p298_p2), 261120   ;;  %vm1039_vm4 = vcmask (!%p298_p2), 195584   ;;  %vm1228_vm5 = vcmask (!%p298_p2), 2048  }
   0x8   : > { %410 = vperm.xlu0 (!%p298_p2), %1708, %v404_v3   ;;  %420 = vperm.xlu1 (!%p298_p2), %1709, %v406_v4  }
   0xc   : > { %415 = vperm.xlu0 (!%p298_p2), %1708, %v405_v5   ;;  %425 = vperm.xlu1 (!%p298_p2), %1709, %v407_v6  }
   0xd   : > { %s2071_s10 = smov (!%p337_p3, %s1295_s10), 1 }
   0xe   : > { %s1695_s15 = smul.u32 320, %s2071_s10  ;;  %s1302_s20 = sshll.u32 %s2071_s10, 2 }
   0xf   : > { %s350_s25 = scalar_lea.vmem %s2069_s9, %s1302_s20 }
  0x10   : > { %s1807_s22 = scalar_lea.vmem %s2060_s0, %s1695_s15  ;;  %s1858_s29 = scalar_lea.vmem %s2061_s1, %s1695_s15 }
  0x11   : > { %v380_v7 = vld [vmem:[%s1807_s22 + $0x80] sm:$0xff]  ;;  %v381_v8 = vld [vmem:[%s1807_s22 + $0x88] sm:$0xff]  ;;  %v382_v12 = vld [vmem:[%s1807_s22 + $0x90] sm:$0xff] }
  0x12   : > { %v364_v9 = vld [vmem:[%s1807_s22] sm:$0xff]  ;;  %v1564_v10 = vpack.c.bf16 %v381_v8, %v380_v7  ;;  %v365_v11 = vld [vmem:[%s1807_s22 + $0x8] sm:$0xff]  ;;  %v383_v13 = vld [vmem:[%s1807_s22 + $0x98] sm:$0xff] }
  0x13   : > { %v1566_v14 = vpack.c.bf16 %v365_v11, %v364_v9  ;;  %v1568_v15 = vpack.c.bf16 %v383_v13, %v382_v12  ;;  %v366_v16 = vld [vmem:[%s1807_s22 + $0x10] sm:$0xff]  ;;  %v367_v17 = vld [vmem:[%s1807_s22 + $0x18] sm:$0xff]  ;;  %v384_v18 = vld [vmem:[%s1807_s22 + $0xa0] sm:$0xff] }
  0x14   : > { %1565 = vmatprep.subr.bf16.mxu0 %v1564_v10  ;;  %v385_v19 = vld [vmem:[%s1807_s22 + $0xa8] sm:$0xff]  ;;  %v1570_v20 = vpack.c.bf16 %v367_v17, %v366_v16  ;;  %v368_v22 = vld [vmem:[%s1807_s22 + $0x20] sm:$0xff]  ;;  %v386_v24 = vld [vmem:[%s1807_s22 + $0xb0] sm:$0xff] }
  0x15   : > { %1567 = vmatpush3.bf16.msra.mxu0 %v1566_v14  ;;  %v1572_v21 = vpack.c.bf16 %v385_v19, %v384_v18  ;;  %v369_v23 = vld [vmem:[%s1807_s22 + $0x28] sm:$0xff]  ;;  %v387_v25 = vld [vmem:[%s1807_s22 + $0xb8] sm:$0xff]  ;;  %v396_v26 = vld [vmem:[%s1807_s22 + $0x100] sm:$0xff] }
  0x16   : > { %1569 = vmatprep.subr.bf16.mxu0 %v1568_v15  ;;  %v397_v27 = vld [vmem:[%s1807_s22 + $0x108] sm:$0xff]  ;;  %v1574_v28 = vpack.c.bf16 %v369_v23, %v368_v22  ;;  %v370_v29 = vld [vmem:[%s1807_s22 + $0x30] sm:$0xff]  ;;  %v1576_v31 = vpack.c.bf16 %v387_v25, %v386_v24  ;;  %v371_v32 = vld [vmem:[%s1807_s22 + $0x38] sm:$0xff] }
  0x17   : > { %v1596_v30 = vpack.c.bf16 %v397_v27, %v396_v26  ;;  %v398_v33 = vld [vmem:[%s1807_s22 + $0x110] sm:$0xff]  ;;  %v399_v34 = vld [vmem:[%s1807_s22 + $0x118] sm:$0xff]  ;;  %v388_v35 = vld [vmem:[%s1807_s22 + $0xc0] sm:$0xff]  ;;  %v1578_v40 = vpack.c.bf16 %v371_v32, %v370_v29 }
  0x18   : > { %v389_v36 = vld [vmem:[%s1807_s22 + $0xc8] sm:$0xff]  ;;  %v1600_v37 = vpack.c.bf16 %v399_v34, %v398_v33  ;;  %v400_v38 = vld [vmem:[%s1807_s22 + $0x120] sm:$0xff]  ;;  %v402_v45 = vld [vmem:[%s1807_s22 + $0x130] sm:$0xff] }
  0x19   : > { %1571 = vmatpush3.bf16.msra.mxu0 %v1570_v20  ;;  %1597 = vmatprep.subr.bf16.mxu1 %v1596_v30  ;;  %v401_v39 = vld [vmem:[%s1807_s22 + $0x128] sm:$0xff]  ;;  %v372_v41 = vld [vmem:[%s1807_s22 + $0x40] sm:$0xff]  ;;  %v1580_v43 = vpack.c.bf16 %v389_v36, %v388_v35  ;;  %v403_v46 = vld [vmem:[%s1807_s22 + $0x138] sm:$0xff] }
  0x1a   : > { %1573 = vmatprep.subr.bf16.mxu0 %v1572_v21  ;;  %1599 = vmatpush3.bf16.msra.mxu1 %v1596_v30  ;;  %v1604_v42 = vpack.c.bf16 %v401_v39, %v400_v38  ;;  %v373_v44 = vld [vmem:[%s1807_s22 + $0x48] sm:$0xff]  ;;  %v390_v47 = vld [vmem:[%s1807_s22 + $0xd0] sm:$0xff]  ;;  %v391_v48 = vld [vmem:[%s1807_s22 + $0xd8] sm:$0xff]  ;;  %v1608_v50 = vpack.c.bf16 %v403_v46, %v402_v45 }
  0x1b   : > { %1601 = vmatprep.subr.bf16.mxu1 %v1600_v37  ;;  %v1582_v49 = vpack.c.bf16 %v373_v44, %v372_v41  ;;  %v1584_v51 = vpack.c.bf16 %v391_v48, %v390_v47  ;;  %v374_v52 = vld [vmem:[%s1807_s22 + $0x50] sm:$0xff]  ;;  %v375_v53 = vld [vmem:[%s1807_s22 + $0x58] sm:$0xff]  ;;  %v392_v54 = vld [vmem:[%s1807_s22 + $0xe0] sm:$0xff] }
  0x1c   : > { %v393_v55 = vld [vmem:[%s1807_s22 + $0xe8] sm:$0xff]  ;;  %v1586_v56 = vpack.c.bf16 %v375_v53, %v374_v52  ;;  %v376_v58 = vld [vmem:[%s1807_s22 + $0x60] sm:$0xff]  ;;  %v394_v60 = vld [vmem:[%s1807_s22 + $0xf0] sm:$0xff] }
  0x1d   : > { %1575 = vmatpush3.bf16.msra.mxu0 %v1574_v28  ;;  %v1588_v57 = vpack.c.bf16 %v393_v55, %v392_v54  ;;  %v377_v59 = vld [vmem:[%s1807_s22 + $0x68] sm:$0xff]  ;;  %v395_v61 = vld [vmem:[%s1807_s22 + $0xf8] sm:$0xff]  ;;  %v378_v4 = vld [vmem:[%s1807_s22 + $0x70] sm:$0xff] }
  0x1e   : > { %1577 = vmatprep.subr.bf16.mxu0 %v1576_v31  ;;  %1603 = vmatpush3.bf16.msra.mxu1 %v1600_v37  ;;  %v1590_v63 = vpack.c.bf16 %v377_v59, %v376_v58  ;;  %v1592_v3 = vpack.c.bf16 %v395_v61, %v394_v60  ;;  %v379_v5 = vld [vmem:[%s1807_s22 + $0x78] sm:$0xff]  ;;  %v834_v6 = vld [vmem:[%s1858_s29 + $0x80] sm:$0xff]  ;;  %v835_v7 = vld [vmem:[%s1858_s29 + $0x88] sm:$0xff] }
  0x1f   : > { %1605 = vmatprep.subr.bf16.mxu1 %v1604_v42  ;;  %v1881_v8 = vld [vmem:[%s2064_s4 + $0x58] sm:$0xff]  ;;  %v1594_v9 = vpack.c.bf16 %v379_v5, %v378_v4  ;;  %v1634_v10 = vpack.c.bf16 %v835_v7, %v834_v6  ;;  %v818_v11 = vld [vmem:[%s1858_s29] sm:$0xff]  ;;  %v819_v12 = vld [vmem:[%s1858_s29 + $0x8] sm:$0xff] }
  0x20   : > { %v836_v13 = vld [vmem:[%s1858_s29 + $0x90] sm:$0xff]  ;;  %v837_v14 = vld [vmem:[%s1858_s29 + $0x98] sm:$0xff]  ;;  %v1892_v15 = vld [vmem:[%s2064_s4] sm:$0xff]  ;;  %v1636_v16 = vpack.c.bf16 %v819_v12, %v818_v11 }
  0x21   : > { %1579 = vmatpush3.bf16.msra.mxu0 %v1578_v40  ;;  %v1897_v17 = vld [vmem:[%s2064_s4 + $0x20] sm:$0xff]  ;;  %v1638_v18 = vpack.c.bf16 %v837_v14, %v836_v13  ;;  %v820_v19 = vld [vmem:[%s1858_s29 + $0x10] sm:$0xff]  ;;  %v821_v20 = vld [vmem:[%s1858_s29 + $0x18] sm:$0xff] }
  0x22   : > { %1581 = vmatprep.subr.bf16.mxu0 %v1580_v43  ;;  %1607 = vmatpush3.bf16.msra.mxu1 %v1604_v42  ;;  %v838_v21 = vld [vmem:[%s1858_s29 + $0xa0] sm:$0xff]  ;;  %v839_v22 = vld [vmem:[%s1858_s29 + $0xa8] sm:$0xff]  ;;  %v355_v23 = vld [vmem:[%s2064_s4 + $0x18] sm:$0xff]  ;;  %v1640_v24 = vpack.c.bf16 %v821_v20, %v820_v19 }
  0x23   : > { %1609 = vmatprep.subr.bf16.mxu1 %v1608_v50  ;;  %v359_v25 = vld [vmem:[%s2064_s4 + $0x38] sm:$0xff]  ;;  %v1642_v26 = vpack.c.bf16 %v839_v22, %v838_v21  ;;  %v822_v27 = vld [vmem:[%s1858_s29 + $0x20] sm:$0xff]  ;;  %v823_v28 = vld [vmem:[%s1858_s29 + $0x28] sm:$0xff] }
  0x24   : > { %v840_v29 = vld [vmem:[%s1858_s29 + $0xb0] sm:$0xff]  ;;  %v841_v30 = vld [vmem:[%s1858_s29 + $0xb8] sm:$0xff]  ;;  %v1644_v32 = vpack.c.bf16 %v823_v28, %v822_v27  ;;  %v842_v37 = vld [vmem:[%s1858_s29 + $0xc0] sm:$0xff] }
  0x25   : > { %1583 = vmatpush3.bf16.msra.mxu0 %v1582_v49  ;;  %v358_v31 = vld [vmem:[%s2064_s4 + $0x30] sm:$0xff]  ;;  %v1646_v34 = vpack.c.bf16 %v841_v30, %v840_v29  ;;  %v825_v36 = vld [vmem:[%s1858_s29 + $0x38] sm:$0xff]  ;;  %v843_v38 = vld [vmem:[%s1858_s29 + $0xc8] sm:$0xff] }
  0x26   : > { %1585 = vmatprep.subr.bf16.mxu0 %v1584_v51  ;;  %1611 = vmatpush3.bf16.msra.mxu1 %v1608_v50  ;;  %v362_v33 = vld [vmem:[%s2064_s4 + $0x50] sm:$0xff]  ;;  %v361_v39 = vld [vmem:[%s2064_s4 + $0x48] sm:$0xff]  ;;  %v1650_v41 = vpack.c.bf16 %v843_v38, %v842_v37  ;;  %v826_v42 = vld [vmem:[%s1858_s29 + $0x40] sm:$0xff] }
  0x27   : > { %v824_v35 = vld [vmem:[%s1858_s29 + $0x30] sm:$0xff]  ;;  %v827_v43 = vld [vmem:[%s1858_s29 + $0x48] sm:$0xff]  ;;  %v845_v45 = vld [vmem:[%s1858_s29 + $0xd8] sm:$0xff] }
  0x28   : > { %v1648_v40 = vpack.c.bf16 %v825_v36, %v824_v35  ;;  %v844_v44 = vld [vmem:[%s1858_s29 + $0xd0] sm:$0xff]  ;;  %v1652_v46 = vpack.c.bf16 %v827_v43, %v826_v42  ;;  %v829_v49 = vld [vmem:[%s1858_s29 + $0x58] sm:$0xff]  ;;  %v846_v50 = vld [vmem:[%s1858_s29 + $0xe0] sm:$0xff] }
  0x29   : > { %1587 = vmatpush3.bf16.msra.mxu0 %v1586_v56  ;;  %1481 = vmatmul.mubr.msk.f32.vlgmr.msra.gmra.mrb[0].mxu1 %vm428_vm0, %v1863_v62  ;;  %v1654_v47 = vpack.c.bf16 %v845_v45, %v844_v44  ;;  %v828_v48 = vld [vmem:[%s1858_s29 + $0x50] sm:$0xff]  ;;  %v847_v51 = vld [vmem:[%s1858_s29 + $0xe8] sm:$0xff]  ;;  %v830_v54 = vld [vmem:[%s1858_s29 + $0x60] sm:$0xff] }
  0x2a   : > { %1589 = vmatprep.subr.bf16.mxu0 %v1588_v57  ;;  %1483 = vmatprep.mubr.msk.f32.mxu1 %vm428_vm0, %v1868_v2  ;;  %v1656_v52 = vpack.c.bf16 %v829_v49, %v828_v48  ;;  %v1658_v53 = vpack.c.bf16 %v847_v51, %v846_v50  ;;  %v831_v55 = vld [vmem:[%s1858_s29 + $0x68] sm:$0xff]  ;;  %v848_v56 = vld [vmem:[%s1858_s29 + $0xf0] sm:$0xff]  ;;  %v849_v57 = vld [vmem:[%s1858_s29 + $0xf8] sm:$0xff] }
  0x2b   : > { %v1660_v58 = vpack.c.bf16 %v831_v55, %v830_v54  ;;  %v832_v59 = vld [vmem:[%s1858_s29 + $0x70] sm:$0xff]  ;;  %v833_v60 = vld [vmem:[%s1858_s29 + $0x78] sm:$0xff] }
  0x2c   : > { %v1664_v61 = vpack.c.bf16 %v833_v60, %v832_v59  ;;  %v621_v5 = vld [vmem:[%s2062_s2 + $0x10] sm:$0xff]  ;;  %v622_v6 = vld [vmem:[%s2062_s2 + $0x18] sm:$0xff] }
  0x2d   : > { %1591 = vmatpush3.bf16.msra.mxu0 %v1590_v63  ;;  %1484 = vmatmul.mubr.msk.f32.gmra.mrb[2].mxu1 %vm428_vm0, %v1881_v8  ;;  %v619_v63 = vld [vmem:[%s2062_s2] sm:$0xff]  ;;  %v1616_v7 = vpack.c.bf16 %v622_v6, %v621_v5  ;;  %v625_v12 = vld [vmem:[%s2062_s2 + $0x30] sm:$0xff]  ;;  %v626_v13 = vld [vmem:[%s2062_s2 + $0x38] sm:$0xff] }
  0x2e   : > { %1593 = vmatprep.subr.bf16.mxu0 %v1592_v3  ;;  %v620_v3 = vld [vmem:[%s2062_s2 + $0x8] sm:$0xff]  ;;  %v1624_v14 = vpack.c.bf16 %v626_v13, %v625_v12  ;;  %v1721_v12 = vmov 0.0  }
  0x2f   : > { %v1612_v4 = vpack.c.bf16 %v620_v3, %v619_v63 }
  0x31   : > { %1595 = vmatpush3.bf16.msra.mxu0 %v1594_v9  ;;  %1613 = vmatprep.subr.bf16.mxu1 %v1612_v4  ;;  %v623_v9 = vld [vmem:[%s2062_s2 + $0x20] sm:$0xff] }
  0x32   : > { %1635 = vmatprep.subr.bf16.mxu0 %v1634_v10  ;;  %1615 = vmatpush3.bf16.msra.mxu1 %v1612_v4  ;;  %v624_v10 = vld [vmem:[%s2062_s2 + $0x28] sm:$0xff] }
  0x33   : > { %1617 = vmatprep.subr.bf16.mxu1 %v1616_v7  ;;  %v1620_v11 = vpack.c.bf16 %v624_v10, %v623_v9 }
  0x34   : > { %506 = vmatmul.mubr.f32.vlgmr.msra.gmra.mrb[0].mxu0 %v1892_v15 }
  0x35   : > { %1637 = vmatpush3.bf16.msra.mxu0 %v1636_v16  ;;  %510 = vmatprep.mubr.f32.mxu0 %v1897_v17 }
  0x36   : > { %1639 = vmatprep.subr.bf16.mxu0 %v1638_v18  ;;  %1619 = vmatpush3.bf16.msra.mxu1 %v1616_v7 }
  0x37   : > { %1621 = vmatprep.subr.bf16.mxu1 %v1620_v11 }
  0x38   : > { %511 = vmatmul.mubr.f32.gmra.mrb[2].mxu0 %v355_v23 }
  0x39   : > { %1641 = vmatpush3.bf16.msra.mxu0 %v1640_v24  ;;  %515 = vmatprep.mubr.f32.mxu0 %v359_v25 }
  0x3a   : > { %1643 = vmatprep.subr.bf16.mxu0 %v1642_v26  ;;  %1623 = vmatpush3.bf16.msra.mxu1 %v1620_v11  ;;  %v1719_v11 = vmov 0.0|0.0  }
  0x3b   : > { %1625 = vmatprep.subr.bf16.mxu1 %v1624_v14 }
  0x3c   : > { %516 = vmatmul.mubr.f32.gmra.mrb[4].mxu0 %v358_v31 }
  0x3d   : > { %1645 = vmatpush3.bf16.msra.mxu0 %v1644_v32  ;;  %520 = vmatprep.mubr.f32.mxu0 %v362_v33 }
  0x3e   : > { %1647 = vmatprep.subr.bf16.mxu0 %v1646_v34  ;;  %1627 = vmatpush3.bf16.msra.mxu1 %v1624_v14 }
  0x3f   : > { %1628 = vmatprep.subr.bf16.mxu1 %v1719_v11 }
  0x40   : > { %521 = vmatmul.mubr.f32.gmra.mrb[6].mxu0 %v361_v39 }
  0x41   : > { %1649 = vmatpush3.bf16.msra.mxu0 %v1648_v40  ;;  %922 = vmatprep.mubr.f32.mxu0 %v1783_v0  ;;  %v1662_v0 = vpack.c.bf16 %v849_v57, %v848_v56 }
  0x42   : > { %1651 = vmatprep.subr.bf16.mxu0 %v1650_v41 }
  0x45   : > { %1653 = vmatpush3.bf16.msra.mxu0 %v1652_v46 }
  0x46   : > { %1655 = vmatprep.subr.bf16.mxu0 %v1654_v47 }
  0x49   : > { %1657 = vmatpush3.bf16.msra.mxu0 %v1656_v52 }
  0x4a   : > { %1659 = vmatprep.subr.bf16.mxu0 %v1658_v53 }
  0x4d   : > { %1661 = vmatpush3.bf16.msra.mxu0 %v1660_v58 }
  0x4e   : > { %1663 = vmatprep.subr.bf16.mxu0 %v1662_v0 }
  0x51   : > { %1665 = vmatpush3.bf16.msra.mxu0 %v1664_v61 }
  0x54   : > { %923 = vmatmul.mubr.f32.vlgmr.msra.gmra.mrb[8].mxu0 %v1892_v15 }
  0x55   : > { %927 = vmatprep.mubr.f32.mxu0 %v1897_v17 }
  0x58   : > { %928 = vmatmul.mubr.f32.gmra.mrb[10].mxu0 %v355_v23 }
  0x59   : > { %932 = vmatprep.mubr.f32.mxu0 %v359_v25 }
  0x5c   : > { %933 = vmatmul.mubr.f32.gmra.mrb[12].mxu0 %v358_v31 }
  0x5d   : > { %937 = vmatprep.mubr.f32.mxu0 %v362_v33 }
  0x60   : > { %938 = vmatmul.mubr.f32.gmra.mrb[14].mxu0 %v361_v39 }
  0x87   : > { %v1969_v19 = vpop.permute.xlu0 %410  ;;  %v1975_v32 = vpop.permute.xlu1 %420 }
  0x8b   : > { %v1972_v26 = vpop.permute.xlu0 %415  ;;  %v1979_v44 = vpop.permute.xlu1 %425 }
  0xfc   : > { %v1482_v15 = vpop.f32.mrb[0].mxu1 }
  0xfd   : > { %v592_v16 = vpop.f32.mrb[1].mxu1 }
 0x100   : > { %v1485_v17 = vpop.f32.mrb[2].mxu1 }
 0x101   : > { %v602_v18 = vpop.f32.mrb[3].mxu1 }
 0x107   : > { %v1355_v20 = vpop.f32.mrb[0].mxu0 }
 0x108   : > { %v1356_v21 = vpop.f32.mrb[1].mxu0 }
 0x109   : > { %v1357_v22 = vadd.f32 %v1356_v21, %v1355_v20  ;;  %v850_v20 = vld [vmem:[%s1858_s29 + $0x100] sm:$0xff]  ;;  %v851_v21 = vld [vmem:[%s1858_s29 + $0x108] sm:$0xff] }
 0x10b   : > { %v508_v23 = vadd.f32 %v1357_v22, %v1969_v19  ;;  %v1358_v24 = vpop.f32.mrb[2].mxu0 }
 0x10c   : > { %v1359_v25 = vpop.f32.mrb[3].mxu0 }
 0x10d   : > { %v1360_v27 = vadd.f32 %v1359_v25, %v1358_v24  ;;  %v593_v28 = vadd.f32 %v592_v16, %v508_v23  ;;  %v1666_v25 = vpack.c.bf16 %v851_v21, %v850_v20 }
 0x10f   : > { %v611_v29 = vmax.f32 %v593_v28, 0.0  ;;  %v513_v30 = vadd.f32 %v1360_v27, %v1972_v26  ;;  %v1361_v31 = vpop.f32.mrb[4].mxu0  ;;  %v852_v28 = vld [vmem:[%s1858_s29 + $0x110] sm:$0xff] }
 0x110   : > { %v1362_v33 = vpop.f32.mrb[5].mxu0 }
 0x111   : > { %v615_v34 = vmin.f32 %v611_v29, 6.0  ;;  %v598_v35 = vadd.f32 %v1482_v15, %v513_v30  ;;  %v1363_v36 = vadd.f32 %v1362_v33, %v1361_v31  ;;  %v853_v29 = vld [vmem:[%s1858_s29 + $0x118] sm:$0xff]  ;;  %v742_v30 = vld [vmem:[%s2066_s6] sm:$0x7] }
 0x112   : > { %v1670_v31 = vpack.c.bf16 %v853_v29, %v852_v28  ;;  %v854_v33 = vld [vmem:[%s1858_s29 + $0x120] sm:$0xff] }
 0x113   : > { %v612_v37 = vmax.f32 %v598_v35, 0.0  ;;  %v1364_v38 = vpop.f32.mrb[6].mxu0  ;;  %1502 = vmatprep.mubr.msk.f32.mxu1 %vm428_vm0, %v615_v34  ;;  %v518_v39 = vadd.f32 %v1363_v36, %v1975_v32  ;;  %v855_v34 = vld [vmem:[%s1858_s29 + $0x128] sm:$0xff]  ;;  %v856_v36 = vld [vmem:[%s1858_s29 + $0x130] sm:$0xff] }
 0x114   : > { %v1365_v40 = vpop.f32.mrb[7].mxu0  ;;  %v1674_v35 = vpack.c.bf16 %v855_v34, %v854_v33 }
 0x115   : > { %v616_v41 = vmin.f32 %v612_v37, 6.0  ;;  %v1366_v42 = vadd.f32 %v1365_v40, %v1364_v38  ;;  %v603_v43 = vadd.f32 %v602_v18, %v518_v39  ;;  %v857_v37 = vld [vmem:[%s1858_s29 + $0x138] sm:$0xff]  ;;  %v1037_v39 = vld [vmem:[%s2063_s3 + $0x8] sm:$0xff] }
 0x116   : > { %v1678_v38 = vpack.c.bf16 %v857_v37, %v856_v36 }
 0x117   : > { %v523_v45 = vadd.f32 %v1366_v42, %v1979_v44  ;;  %v613_v46 = vmax.f32 %v603_v43, 0.0  ;;  %1503 = vmatmul.mubr.msk.f32.vlgmr.msra.gmra.mrb[4].mxu1 %vm428_vm0, %v616_v41 }
 0x119   : > { %v608_v47 = vadd.f32 %v1485_v17, %v523_v45  ;;  %v617_v48 = vmin.f32 %v613_v46, 6.0 }
 0x11b   : > { %v614_v49 = vmax.f32 %v608_v47, 0.0  ;;  %1505 = vmatprep.mubr.msk.f32.mxu1 %vm428_vm0, %v617_v48 }
 0x11d   : > { %v618_v50 = vmin.f32 %v614_v49, 6.0 }
 0x11f   : > { %1506 = vmatmul.mubr.msk.f32.gmra.mrb[6].mxu1 %vm428_vm0, %v618_v50 }
 0x120   : > { %1516 = vmatprep.mubr.msk.f32.mxu1 %vm1720_vm2, %v1721_v12 }
 0x127   : > { %v1428_v51 = vpop.f32.mrb[8].mxu0 }
 0x128   : > { %v1429_v52 = vpop.f32.mrb[9].mxu0 }
 0x129   : > { %v1985_v53 = vadd.f32 %v1429_v52, %v1428_v51 }
 0x12b   : > { %v1431_v54 = vpop.f32.mrb[10].mxu0  ;;  %v925_v41 = vadd.f32 %v1985_v53, %v1969_v19 }
 0x12c   : > { %v1432_v55 = vpop.f32.mrb[11].mxu0 }
 0x12d   : > { %v1987_v56 = vadd.f32 %v1432_v55, %v1431_v54 }
 0x12f   : > { %v1434_v57 = vpop.f32.mrb[12].mxu0 }
 0x130   : > { %v1435_v58 = vpop.f32.mrb[13].mxu0 }
 0x131   : > { %v1989_v0 = vadd.f32 %v1435_v58, %v1434_v57 }
 0x133   : > { %v1437_v59 = vpop.f32.mrb[14].mxu0  ;;  %v935_v50 = vadd.f32 %v1989_v0, %v1975_v32 }
 0x134   : > { %v1438_v60 = vpop.f32.mrb[15].mxu0 }
 0x135   : > { %v1991_v61 = vadd.f32 %v1438_v60, %v1437_v59 }
 0x137   : > { %v940_v47 = vadd.f32 %v1991_v61, %v1979_v44 }
 0x1ea   : > { %v1504_v63 = vpop.f32.mrb[4].mxu1 }
 0x1eb   : > { %v705_v3 = vpop.f32.mrb[5].mxu1  ;;  %v728_v4 = vsel %vm724_vm1, %v1504_v63, 0.0 }
 0x1ec   : > { %729 = vadd.xlane.f32.xlu1 %v728_v4  ;;  %v725_v5 = vsel %vm724_vm1, %v705_v3, 0.0 }
 0x1ed   : > { %726 = vadd.xlane.f32.xlu0 %v725_v5 }
 0x1f2   : > { %v1507_v6 = vpop.f32.mrb[6].mxu1 }
 0x1f3   : > { %v715_v7 = vpop.f32.mrb[7].mxu1  ;;  %v734_v10 = vsel %vm724_vm1, %v1507_v6, 0.0 }
 0x1f4   : > { %v731_v9 = vsel %vm724_vm1, %v715_v7, 0.0 }
 0x1f5   : > { %732 = vadd.xlane.f32.xlu0 %v731_v9 }
 0x1f9   : > { %735 = vadd.xlane.f32.xlu0 %v734_v10 }
 0x279   : > { %v730_v13 = vpop.xlane.xlu1 %729 }
 0x27a   : > { %v739_v14 = vmul.f32 0.25, %v730_v13  ;;  %v727_v15 = vpop.xlane.xlu0 %726 }
 0x27b   : > { %v738_v16 = vmul.f32 0.25, %v727_v15  ;;  %v1153_v15 = vld [vmem:[%s2067_s7] sm:$0x7] }
 0x27d   : > { %v1629_v17 = vpack.c.bf16 %v739_v14, %v738_v16  ;;  %v351_v16 = vld [vmem:[%s2068_s8] sm:$0x7] }
 0x27f   : > { %1630 = vmatpush3.bf16.msra.mxu1 %v1629_v17 }
 0x280   : > { %1631 = vmatprep.subr.bf16.mxu1 %v1719_v11 }
 0x282   : > { %v733_v18 = vpop.xlane.xlu0 %732 }
 0x283   : > { %v740_v23 = vmul.f32 0.25, %v733_v18 }
 0x286   : > { %v736_v22 = vpop.xlane.xlu0 %735 }
 0x287   : > { %v741_v24 = vmul.f32 0.25, %v736_v22 }
 0x289   : > { %v1632_v27 = vpack.c.bf16 %v741_v24, %v740_v23 }
 0x28b   : > { %1633 = vmatpush3.bf16.msra.mxu1 %v1632_v27 }
 0x28c   : > { %1667 = vmatprep.subr.bf16.mxu1 %v1666_v25 }
 0x28e   : > { %1517 = vmatmul.mubr.msk.f32.vlgmr.msra.gmra.mrb[8].mxu1 %vm743_vm3, %v742_v30 }
 0x28f   : > { %1669 = vmatpush3.bf16.msra.mxu1 %v1666_v25  ;;  %1535 = vmatprep.mubr.msk.f32.mxu1 %vm428_vm0, %v1789_v1  ;;  %v1036_v1 = vld [vmem:[%s2063_s3] sm:$0xff] }
 0x290   : > { %1671 = vmatprep.subr.bf16.mxu1 %v1670_v31  ;;  %v1682_v40 = vpack.c.bf16 %v1037_v39, %v1036_v1 }
 0x293   : > { %1673 = vmatpush3.bf16.msra.mxu1 %v1670_v31 }
 0x294   : > { %1675 = vmatprep.subr.bf16.mxu1 %v1674_v35 }
 0x297   : > { %1677 = vmatpush3.bf16.msra.mxu1 %v1674_v35 }
 0x298   : > { %1679 = vmatprep.subr.bf16.mxu1 %v1678_v38 }
 0x29b   : > { %1681 = vmatpush3.bf16.msra.mxu1 %v1678_v38 }
 0x29c   : > { %1683 = vmatprep.subr.bf16.mxu1 %v1682_v40 }
 0x29e   : > { %1536 = vmatmul.mubr.msk.f32.vlgmr.msra.gmra.mrb[10].mxu1 %vm428_vm0, %v1863_v62  ;;  %v1038_v62 = vld [vmem:[%s2063_s3 + $0x10] sm:$0xff] }
 0x29f   : > { %1538 = vmatprep.mubr.msk.f32.mxu1 %vm428_vm0, %v1868_v2  ;;  %1685 = vmatpush3.bf16.msra.mxu1 %v1682_v40  ;;  %v930_v2 = vadd.f32 %v1987_v56, %v1972_v26 }
 0x2a0   : > { %1545 = vmatprep.subr.mxu1 %v1038_v62 }
 0x2a2   : > { %1539 = vmatmul.mubr.msk.f32.gmra.mrb[12].mxu1 %vm428_vm0, %v1881_v8 }
 0x2a3   : > { %1546 = vmatpush3.msra.mxu1 %v1038_v62 }
 0x2a4   : > { %1686 = vmatprep.subr.bf16.mxu1 %v1719_v11 }
 0x371   : > { %v1537_v8 = vpop.f32.mrb[10].mxu1 }
 0x372   : > { %v1015_v42 = vadd.f32 %v1537_v8, %v930_v2  ;;  %v1009_v43 = vpop.f32.mrb[11].mxu1 }
 0x373   : > { %v1010_v45 = vadd.f32 %v1009_v43, %v925_v41 }
 0x374   : > { %v1029_v46 = vmax.f32 %v1015_v42, 0.0 }
 0x375   : > { %v1028_v48 = vmax.f32 %v1010_v45, 0.0  ;;  %v1540_v49 = vpop.f32.mrb[12].mxu1 }
 0x376   : > { %v1025_v51 = vadd.f32 %v1540_v49, %v940_v47  ;;  %v1019_v52 = vpop.f32.mrb[13].mxu1  ;;  %v1033_v55 = vmin.f32 %v1029_v46, 6.0 }
 0x377   : > { %v1032_v26 = vmin.f32 %v1028_v48, 6.0  ;;  %v1020_v54 = vadd.f32 %v1019_v52, %v935_v50 }
 0x378   : > { %v1031_v56 = vmax.f32 %v1025_v51, 0.0 }
 0x379   : > { %v1030_v19 = vmax.f32 %v1020_v54, 0.0  ;;  %1547 = vmatprep.mubr.msk.f32.mxu1 %vm1039_vm4, %v1032_v26 }
 0x37a   : > { %1548 = vmatmul.mubr.msk.f32.vlgmr.msra.gmra.mrb[14].mxu1 %vm1039_vm4, %v1033_v55  ;;  %v1035_v57 = vmin.f32 %v1031_v56, 6.0 }
 0x37b   : > { %v1034_v53 = vmin.f32 %v1030_v19, 6.0 }
 0x37d   : > { %1550 = vmatprep.mubr.msk.f32.mxu1 %vm1039_vm4, %v1034_v53 }
 0x37e   : > { %1551 = vmatmul.mubr.msk.f32.gmra.mrb[16].mxu1 %vm1039_vm4, %v1035_v57 }
 0x37f   : > { %1561 = vmatprep.mubr.msk.f32.mxu1 %vm1720_vm2, %v1721_v12 }
 0x44d   : > { %v1549_v44 = vpop.f32.mrb[14].mxu1 }
 0x44e   : > { %v1118_v58 = vpop.f32.mrb[15].mxu1  ;;  %v1140_v32 = vsel %vm724_vm1, %v1549_v44, 0.0 }
 0x44f   : > { %1141 = vadd.xlane.f32.xlu0 %v1140_v32  ;;  %v1137_v0 = vsel %vm724_vm1, %v1118_v58, 0.0 }
 0x450   : > { %1138 = vadd.xlane.f32.xlu1 %v1137_v0 }
 0x451   : > { %v1552_v59 = vpop.f32.mrb[16].mxu1 }
 0x452   : > { %v1128_v60 = vpop.f32.mrb[17].mxu1  ;;  %v1146_v61 = vsel %vm724_vm1, %v1552_v59, 0.0 }
 0x453   : > { %1147 = vadd.xlane.f32.xlu0 %v1146_v61  ;;  %v1143_v63 = vsel %vm724_vm1, %v1128_v60, 0.0 }
 0x454   : > { %1144 = vadd.xlane.f32.xlu1 %v1143_v63 }
 0x4dc   : > { %v1142_v3 = vpop.xlane.xlu0 %1141 }
 0x4dd   : > { %v1150_v4 = vmul.f32 0.25, %v1142_v3  ;;  %v1139_v5 = vpop.xlane.xlu1 %1138 }
 0x4de   : > { %v1149_v6 = vmul.f32 0.25, %v1139_v5 }
 0x4e0   : > { %v1687_v7 = vpack.c.bf16 %v1150_v4, %v1149_v6  ;;  %v1148_v9 = vpop.xlane.xlu0 %1147 }
 0x4e1   : > { %v1152_v10 = vmul.f32 0.25, %v1148_v9  ;;  %v1145_v12 = vpop.xlane.xlu1 %1144 }
 0x4e2   : > { %v1151_v13 = vmul.f32 0.25, %v1145_v12  ;;  %1688 = vmatpush3.bf16.msra.mxu1 %v1687_v7 }
 0x4e3   : > { %1689 = vmatprep.subr.bf16.mxu1 %v1719_v11 }
 0x4e4   : > { %v1690_v14 = vpack.c.bf16 %v1152_v10, %v1151_v13 }
 0x4e6   : > { %1691 = vmatpush3.bf16.msra.mxu1 %v1690_v14 }
 0x4e9   : > { %1562 = vmatmul.mubr.msk.f32.vlgmr.msra.gmra.mrb[8].mxu1 %vm743_vm3, %v1153_v15 }
 0x5bc   : > { %v1223_v17 = vpop.f32.mrb[8].mxu1 }
 0x5bd   : > { %v1692_v11 = vadd.f32 %v1223_v17, %v351_v16  ;;  %v1563_v18 = vpop.f32.mrb[9].mxu1 }
 0x5bf   : > { %1229 = vst.msk [vmem:[%s350_s25] sm:$0x7] %vm1228_vm5, %v1692_v11 }
 0x5c0 PF: > { %s19_s30 = sadd.s32 1, %s1716_s30  }
 0x5c1   : > { %p16_p4 = scmp.ge.s32.totalorder %s19_s30, 4  }
 0x5c3   :  { %18 = sbr.rel (!%p16_p4) target bundleno = 1 (0x1), region = 89 }

</bundles_post_ra>
